<compile_context>
chip_gen: v7x
topology: tpu7x:2x2x1
jax: 0.10.0
libtpu: 0.0.40
codegen_flags: <defaults>
</compile_context>

<pallas_src>
import functools

import jax
import jax.numpy as jnp
import numpy as np
from jax import lax
from jax.experimental import pallas as pl
from jax.experimental.pallas import tpu as pltpu


# ----------------------------- Fused Pallas kernel ---------------------------

def _fused_block_kernel(x_ref, w_ref, s_ref, m_ref, o_ref, *, H, W):
    """Fused ConvTranspose2d(2,2) -> Conv2d(3,3,'same') -> BN(eval) -> ReLU for one image.

    x_ref : (1, Cin, HW)         bf16 input, spatial flattened onto the lane axis
    w_ref : (4*Cout, 9*(Cin+1))  bf16 composite weights (BN scale folded in)
    s_ref : (4*Cout, 1)          f32 folded shift (conv_b*scale + bn_shift) per parity/channel
    m_ref : (2, HW)              bf16 column-edge masks [j >= 1, j <= W-2]
    o_ref : (1, 4*Cout, HW)      f32 output, row order p*Cout + c with parity p = 2a + b
    """
    HW = H * W

    x = x_ref[0]                                                    # (Cin, HW) bf16
    # Constant-ones row: carries the deconv bias through the composite weights.
    xa = jnp.concatenate([x, jnp.ones((1, HW), x.dtype)], axis=0)   # (Ca, HW)

    # Flat zero pad of W+1 lanes per side: every row-out-of-bounds tap read lands in the pad,
    # so only the two column-edge masks are ever needed (no 2-D halo buffer, no reshapes).
    zpad = jnp.zeros((xa.shape[0], W + 1), x.dtype)
    xp = jnp.concatenate([zpad, xa, zpad], axis=1)                  # (Ca, HW + 2W + 2)

    col_mask = {-1: m_ref[0:1, :], 0: None, 1: m_ref[1:2, :]}       # (1, HW) bf16 each

    # 3x3 im2col as 9 static lane shifts; taps stacked on sublanes -> (9*Ca, HW) bf16.
    taps = []
    for di in (-1, 0, 1):
        for dj in (-1, 0, 1):
            off = di * W + dj + (W + 1)
            tap = xp[:, off:off + HW]                               # (Ca, HW)
            m = col_mask[dj]
            if m is not None:
                tap = tap * m                                       # kill column wrap-around
            taps.append(tap)
    patch = jnp.concatenate(taps, axis=0)                           # (9*Ca, HW)

    # Single MXU contraction (bf16 operands, f32 accumulation); spatial stays on lanes so the
    # output stores are lane-dense.
    acc = lax.dot_general(w_ref[...], patch, (((1,), (0,)), ((), ())),
                          preferred_element_type=jnp.float32)       # (4*Cout, HW)
    out = jnp.maximum(acc + s_ref[...], 0.0)                        # folded bias/BN + ReLU
    o_ref[0] = out.astype(o_ref.dtype)


# ------------------------ Parameter composition (wrapper) --------------------

def _compose_block_params(params, eps=1e-5):
    """Compose deconv o conv3x3 o BN-scale into one (4*Cout, 9*(Cin+1)) matrix.

    Output row pc = p*Cout + c is (parity p = 2a+b, out channel c); column k = t*(Cin+1) + r is
    input tap t = (di+1)*3 + (dj+1) at spatial shift (di, dj); within a tap the first Cin rows
    multiply x channels, the last multiplies the constant-ones row (deconv bias).
    """
    wt = params["deconv_w"].astype(jnp.float32)      # (Cin, Cout, 2, 2)
    bt = params["deconv_b"].astype(jnp.float32)      # (Cout,)
    wc = params["conv_w"].astype(jnp.float32)        # (Cout, Cout, 3, 3)
    bc = params["conv_b"].astype(jnp.float32)        # (Cout,)
    Cin, Cout = wt.shape[0], wt.shape[1]
    Ca = Cin + 1

    scale = params["bn_gamma"].astype(jnp.float32) / jnp.sqrt(
        params["bn_var"].astype(jnp.float32) + eps)
    shift = params["bn_beta"].astype(jnp.float32) - params["bn_mean"].astype(jnp.float32) * scale

    blocks = [[jnp.zeros((Ca, Cout), jnp.float32) for _ in range(4)] for _ in range(9)]
    for a in range(2):
        for b in range(2):
            p = 2 * a + b
            for dh in (-1, 0, 1):
                for dw in (-1, 0, 1):
                    # output row 2i+a+dh == upsampled row 2*(i+di)+kh
                    kh, di = (a + dh) % 2, (a + dh) // 2
                    kw, dj = (b + dw) % 2, (b + dw) // 2
                    t = (di + 1) * 3 + (dj + 1)
                    B = wc[:, :, dh + 1, dw + 1].T                       # (Cmid, Cout)
                    contrib = jnp.concatenate(
                        [wt[:, :, kh, kw] @ B,                           # x-channel rows
                         (bt @ B)[None, :]], axis=0)                     # ones-row (bias)
                    blocks[t][p] = blocks[t][p] + contrib

    w_big = jnp.stack([jnp.stack(row, axis=0) for row in blocks], axis=0)  # (t, p, r, c)
    w_big = w_big * scale[None, None, None, :]                             # fold BN scale
    w_k = jnp.transpose(w_big, (1, 3, 0, 2)).reshape(4 * Cout, 9 * Ca)     # (p*Cout+c, t*Ca+r)

    s_fold = jnp.tile(bc * scale + shift, 4).reshape(4 * Cout, 1)          # conv bias + BN shift
    return w_k.astype(jnp.bfloat16), s_fold.astype(jnp.float32)


def _pick_vmem_limit_bytes():
    """Use most of VMEM on v5e/v6e (128 MiB) without over-committing v7x (64 MiB)."""
    try:
        cap = int(pltpu.get_tpu_info().vmem_capacity_bytes)
        return int(min(100 * 1024 * 1024, (cap * 3) // 4))
    except Exception:
        return 32 * 1024 * 1024


# --------------------------------- Wrapper -----------------------------------

def deconv2d_block(x_nchw, params, eps=1e-5):
    """Forward pass of Deconv2DBlock.  Input/output in NCHW like PyTorch."""
    N, Cin, H, W = x_nchw.shape
    Cout = params["deconv_w"].shape[1]
    Ca, HW = Cin + 1, H * W
    K, C4 = 9 * Ca, 4 * Cout

    w_fold, s_fold = _compose_block_params(params, eps)

    # Keep NCHW, flatten spatial onto the lane axis, cast to bf16 (halves input DMA; the MXU
    # operands are bf16 anyway).  No layout transpose on the input path.
    x = x_nchw.reshape(N, Cin, HW).astype(jnp.bfloat16)

    # Column-edge validity masks (static in H, W), built once at trace time with numpy.
    col = np.arange(HW, dtype=np.int64) % W
    masks = jnp.asarray(np.stack([(col >= 1), (col <= W - 2)]).astype(np.float32),
                        dtype=jnp.bfloat16)                                 # (2, HW)

    kernel = functools.partial(_fused_block_kernel, H=H, W=W)
    out = pl.pallas_call(
        kernel,
        out_shape=jax.ShapeDtypeStruct((N, C4, HW), jnp.float32),
        grid=(N,),
        in_specs=[
            pl.BlockSpec((1, Cin, HW), lambda n: (n, 0, 0)),
            pl.BlockSpec((C4, K), lambda n: (0, 0)),
            pl.BlockSpec((C4, 1), lambda n: (0, 0)),
            pl.BlockSpec((2, HW), lambda n: (0, 0)),
        ],
        out_specs=pl.BlockSpec((1, C4, HW), lambda n: (n, 0, 0)),
        compiler_params=pltpu.CompilerParams(
            dimension_semantics=("parallel",),          # N=2: both v7x TensorCores get work
            vmem_limit_bytes=_pick_vmem_limit_bytes(),
        ),
        cost_estimate=pl.CostEstimate(
            flops=2 * N * HW * K * C4,
            transcendentals=0,
            bytes_accessed=(N * Cin * HW * 2) + (K * C4 * 2) + (2 * HW * 2)
                           + (N * C4 * HW * 4),
        ),
    )(x, w_fold, s_fold, masks)

    # Pixel shuffle + back to NCHW in one output transpose
    # (kernel output row order is p*Cout + c with parity p = 2a + b).
    out = out.reshape(N, 2, 2, Cout, H, W)
    out = jnp.transpose(out, (0, 3, 4, 1, 5, 2)).reshape(N, Cout, 2 * H, 2 * W)
    return out


# --------------------------- Pure-JAX reference ------------------------------

def deconv2d_block_ref(x_nchw, params, eps=1e-5):
    """Reference using XLA convolutions (NCHW), mirrors PyTorch semantics."""
    wt = params["deconv_w"]                     # (Cin, Cout, 2, 2)
    Cout = wt.shape[1]
    # ConvTranspose2d(k=2, s=2, p=0) == conv(lhs_dilation=2, pad=k-1, flipped W^T)
    w_conv = jnp.flip(jnp.transpose(wt, (1, 0, 2, 3)), axis=(2, 3))   # (Cout, Cin, 2, 2)
    y = lax.conv_general_dilated(
        x_nchw.astype(jnp.float32), w_conv.astype(jnp.float32),
        window_strides=(1, 1), padding=((1, 1), (1, 1)),
        lhs_dilation=(2, 2),
        dimension_numbers=("NCHW", "OIHW", "NCHW"))
    y = y + params["deconv_b"].reshape(1, Cout, 1, 1)

    z = lax.conv_general_dilated(
        y, params["conv_w"].astype(jnp.float32),
        window_strides=(1, 1), padding=((1, 1), (1, 1)),
        dimension_numbers=("NCHW", "OIHW", "NCHW"))
    z = z + params["conv_b"].reshape(1, Cout, 1, 1)

    scale = params["bn_gamma"] / jnp.sqrt(params["bn_var"] + eps)
    shift = params["bn_beta"] - params["bn_mean"] * scale
    z = z * scale.reshape(1, Cout, 1, 1) + shift.reshape(1, Cout, 1, 1)
    return jnp.maximum(z, 0.0)


# ------------------------------- Main ----------------------------------------

if __name__ == "__main__":
    N, Cin, H, W = 2, 4, 16, 16
    Cout = 8

    key = jax.random.PRNGKey(0)
    keys = jax.random.split(key, 9)
    params = {
        "deconv_w": 0.1 * jax.random.normal(keys[0], (Cin, Cout, 2, 2), jnp.float32),
        "deconv_b": 0.1 * jax.random.normal(keys[1], (Cout,), jnp.float32),
        "conv_w":   0.1 * jax.random.normal(keys[2], (Cout, Cout, 3, 3), jnp.float32),
        "conv_b":   0.1 * jax.random.normal(keys[3], (Cout,), jnp.float32),
        "bn_gamma": 1.0 + 0.1 * jax.random.normal(keys[4], (Cout,), jnp.float32),
        "bn_beta":  0.1 * jax.random.normal(keys[5], (Cout,), jnp.float32),
        "bn_mean":  0.05 * jax.random.normal(keys[6], (Cout,), jnp.float32),
        "bn_var":   1.0 + 0.1 * jnp.abs(jax.random.normal(keys[7], (Cout,), jnp.float32)),
    }
    x = jax.random.normal(keys[8], (N, Cin, H, W), jnp.float32)

    fwd = jax.jit(deconv2d_block)
    out = jax.block_until_ready(fwd(x, params))
    assert out.shape == (N, Cout, 2 * H, 2 * W), out.shape

    ref = jax.block_until_ready(deconv2d_block_ref(x, params))
    err = float(jnp.max(jnp.abs(out - ref)))
    assert err < 2e-2, f"max abs diff vs reference: {err}"   # bf16 matmul, f32 accumulate

    print("KERNEL_OK")
</pallas_src>

<mosaic_0001>
module attributes {stable_mosaic.version = 11 : i64} {
  func.func @_fused_block_kernel(%arg0: i32, %arg1: memref<1x4x256xbf16, #tpu.memory_space<vmem>>, %arg2: memref<32x45xbf16, #tpu.memory_space<vmem>>, %arg3: memref<32x1xf32, #tpu.memory_space<vmem>>, %arg4: memref<2x256xbf16, #tpu.memory_space<vmem>>, %arg5: memref<1x32x256xf32, #tpu.memory_space<vmem>>) attributes {dimension_semantics = [#tpu.dimension_semantics<parallel>], iteration_bounds = array<i64: 2>, scalar_prefetch = 0 : i64, scratch_operands = 0 : i64, tpu.core_type = #tpu.core_type<tc>, window_params = [{transform_indices = @transform_0, window_bounds = array<i64: 1, 4, 256>}, {pipeline_mode = #tpu.pipeline_mode<synchronous>, transform_indices = @transform_1, window_bounds = array<i64: 32, 45>}, {pipeline_mode = #tpu.pipeline_mode<synchronous>, transform_indices = @transform_2, window_bounds = array<i64: 32, 1>}, {pipeline_mode = #tpu.pipeline_mode<synchronous>, transform_indices = @transform_3, window_bounds = array<i64: 2, 256>}, {transform_indices = @transform_4, window_bounds = array<i64: 1, 32, 256>}]} {
    %c0 = arith.constant 0 : index
    %c0_0 = arith.constant 0 : index
    %c0_1 = arith.constant 0 : index
    %0 = vector.load %arg1[%c0, %c0_0, %c0_1] : memref<1x4x256xbf16, #tpu.memory_space<vmem>>, vector<1x4x256xbf16>
    %1 = vector.shape_cast %0 : vector<1x4x256xbf16> to vector<4x256xbf16>
    %cst = arith.constant 1.000000e+00 : bf16
    %2 = vector.broadcast %cst : bf16 to vector<1x256xbf16>
    %3 = tpu.concatenate %1, %2 in 0 : vector<4x256xbf16>, vector<1x256xbf16> -> vector<5x256xbf16>
    %cst_2 = arith.constant 0.000000e+00 : bf16
    %4 = vector.broadcast %cst_2 : bf16 to vector<5x17xbf16>
    %5 = tpu.concatenate %4, %3, %4 in 1 : vector<5x17xbf16>, vector<5x256xbf16>, vector<5x17xbf16> -> vector<5x290xbf16>
    %c0_3 = arith.constant 0 : index
    %c0_4 = arith.constant 0 : index
    %6 = vector.load %arg4[%c0_3, %c0_4] : memref<2x256xbf16, #tpu.memory_space<vmem>>, vector<1x256xbf16>
    %c1 = arith.constant 1 : index
    %c0_5 = arith.constant 0 : index
    %7 = vector.load %arg4[%c1, %c0_5] : memref<2x256xbf16, #tpu.memory_space<vmem>>, vector<1x256xbf16>
    %8 = vector.extract_strided_slice %5 {offsets = [0, 0], sizes = [5, 256], strides = [1, 1]} : vector<5x290xbf16> to vector<5x256xbf16>
    %9 = vector.broadcast %6 : vector<1x256xbf16> to vector<5x256xbf16>
    %10 = arith.mulf %8, %9 : vector<5x256xbf16>
    %11 = vector.extract_strided_slice %5 {offsets = [0, 1], sizes = [5, 256], strides = [1, 1]} : vector<5x290xbf16> to vector<5x256xbf16>
    %12 = vector.extract_strided_slice %5 {offsets = [0, 2], sizes = [5, 256], strides = [1, 1]} : vector<5x290xbf16> to vector<5x256xbf16>
    %13 = vector.broadcast %7 : vector<1x256xbf16> to vector<5x256xbf16>
    %14 = arith.mulf %12, %13 : vector<5x256xbf16>
    %15 = vector.extract_strided_slice %5 {offsets = [0, 16], sizes = [5, 256], strides = [1, 1]} : vector<5x290xbf16> to vector<5x256xbf16>
    %16 = vector.broadcast %6 : vector<1x256xbf16> to vector<5x256xbf16>
    %17 = arith.mulf %15, %16 : vector<5x256xbf16>
    %18 = vector.extract_strided_slice %5 {offsets = [0, 17], sizes = [5, 256], strides = [1, 1]} : vector<5x290xbf16> to vector<5x256xbf16>
    %19 = vector.extract_strided_slice %5 {offsets = [0, 18], sizes = [5, 256], strides = [1, 1]} : vector<5x290xbf16> to vector<5x256xbf16>
    %20 = vector.broadcast %7 : vector<1x256xbf16> to vector<5x256xbf16>
    %21 = arith.mulf %19, %20 : vector<5x256xbf16>
    %22 = vector.extract_strided_slice %5 {offsets = [0, 32], sizes = [5, 256], strides = [1, 1]} : vector<5x290xbf16> to vector<5x256xbf16>
    %23 = vector.broadcast %6 : vector<1x256xbf16> to vector<5x256xbf16>
    %24 = arith.mulf %22, %23 : vector<5x256xbf16>
    %25 = vector.extract_strided_slice %5 {offsets = [0, 33], sizes = [5, 256], strides = [1, 1]} : vector<5x290xbf16> to vector<5x256xbf16>
    %26 = vector.extract_strided_slice %5 {offsets = [0, 34], sizes = [5, 256], strides = [1, 1]} : vector<5x290xbf16> to vector<5x256xbf16>
    %27 = vector.broadcast %7 : vector<1x256xbf16> to vector<5x256xbf16>
    %28 = arith.mulf %26, %27 : vector<5x256xbf16>
    %29 = tpu.concatenate %10, %11, %14, %17, %18, %21, %24, %25, %28 in 0 : vector<5x256xbf16>, vector<5x256xbf16>, vector<5x256xbf16>, vector<5x256xbf16>, vector<5x256xbf16>, vector<5x256xbf16>, vector<5x256xbf16>, vector<5x256xbf16>, vector<5x256xbf16> -> vector<45x256xbf16>
    %c0_6 = arith.constant 0 : index
    %c0_7 = arith.constant 0 : index
    %30 = vector.load %arg2[%c0_6, %c0_7] : memref<32x45xbf16, #tpu.memory_space<vmem>>, vector<32x45xbf16>
    %cst_8 = arith.constant dense<0.000000e+00> : vector<32x256xf32>
    %31 = tpu.matmul %30, %29, %cst_8 {dimension_numbers = #tpu.dot_dimension_numbers<[1], [0], [0], [1], [0, 0, 1, 1], [], []>} : vector<32x45xbf16>, vector<45x256xbf16>, vector<32x256xf32> -> vector<32x256xf32>
    %c0_9 = arith.constant 0 : index
    %c0_10 = arith.constant 0 : index
    %32 = vector.load %arg3[%c0_9, %c0_10] : memref<32x1xf32, #tpu.memory_space<vmem>>, vector<32x1xf32>
    %33 = vector.broadcast %32 : vector<32x1xf32> to vector<32x256xf32>
    %34 = arith.addf %31, %33 : vector<32x256xf32>
    %cst_11 = arith.constant 0.000000e+00 : f32
    %35 = vector.broadcast %cst_11 : f32 to vector<32x256xf32>
    %36 = arith.maximumf %34, %35 : vector<32x256xf32>
    %c0_12 = arith.constant 0 : index
    %c0_13 = arith.constant 0 : index
    %c0_14 = arith.constant 0 : index
    %37 = vector.load %arg5[%c0_12, %c0_13, %c0_14] : memref<1x32x256xf32, #tpu.memory_space<vmem>>, vector<1x32x256xf32>
    %38 = vector.shape_cast %37 : vector<1x32x256xf32> to vector<32x256xf32>
    %39 = vector.shape_cast %36 : vector<32x256xf32> to vector<1x32x256xf32>
    tpu.vector_store %arg5[%c0_12, %c0_13, %c0_14], %39 {strides = array<i32>} : memref<1x32x256xf32, #tpu.memory_space<vmem>>, vector<1x32x256xf32>,
    return
  }
  func.func @transform_0(%arg0: i32) -> (i32, i32, i32) {
    %c0_i32 = arith.constant 0 : i32
    %c0_i32_0 = arith.constant 0 : i32
    %c0_i32_1 = arith.constant 0 : i32
    return %arg0, %c0_i32, %c0_i32_0 : i32, i32, i32
  }
  func.func @transform_1(%arg0: i32) -> (i32, i32) {
    %c0_i32 = arith.constant 0 : i32
    %c0_i32_0 = arith.constant 0 : i32
    %c0_i32_1 = arith.constant 0 : i32
    return %c0_i32, %c0_i32_0 : i32, i32
  }
  func.func @transform_2(%arg0: i32) -> (i32, i32) {
    %c0_i32 = arith.constant 0 : i32
    %c0_i32_0 = arith.constant 0 : i32
    %c0_i32_1 = arith.constant 0 : i32
    return %c0_i32, %c0_i32_0 : i32, i32
  }
  func.func @transform_3(%arg0: i32) -> (i32, i32) {
    %c0_i32 = arith.constant 0 : i32
    %c0_i32_0 = arith.constant 0 : i32
    %c0_i32_1 = arith.constant 0 : i32
    return %c0_i32, %c0_i32_0 : i32, i32
  }
  func.func @transform_4(%arg0: i32) -> (i32, i32, i32) {
    %c0_i32 = arith.constant 0 : i32
    %c0_i32_0 = arith.constant 0 : i32
    %c0_i32_1 = arith.constant 0 : i32
    return %arg0, %c0_i32, %c0_i32_0 : i32, i32, i32
  }
}

</mosaic_0001>

<bundles_post_ra>
// kernel: tile.8
= control target key start
LH: loop header
LB: loop body
LE: loop exit
PB: predicated region body
PF: predicated region fallthrough
CT: control target
= control target key end

     0   :  { %s22_s0 = inlined_call_operand.vmem [shape: f32[8], index: 0, kind: input, shape index: {}]   ;;  %s23_s1 = inlined_call_operand.vmem [shape: f32[4,8], index: 1, kind: output, shape index: {}]  }
   0x1   :  { %v4_v0 = vld [vmem:[%s22_s0] ss:$0 sm:$0xff] }
   0x2   :  { %5 = vst [vmem:[%s23_s1] sm:$0xf] %v4_v0 }

// kernel: tile.0
= control target key start
LH: loop header
LB: loop body
LE: loop exit
PB: predicated region body
PF: predicated region fallthrough
CT: control target
= control target key end

     0   :  { %s66_s8 = smov 125   ;;  %vm7_vm0 = vcmask 7168   ;;  %s67_s11 = smov 126   ;;  %s117_s0 = inlined_call_operand.vmem [shape: f32[4,8], index: 0, kind: input, shape index: {}]   ;;  %s118_s1 = inlined_call_operand.vmem [shape: f32[32,1], index: 1, kind: output, shape index: {}]  }
   0x1   :  { %v4_v0 = vld [vmem:[%s117_s0] sm:$0xf]  ;;  %s65_s0 = smov 127   ;;  %s68_s12 = smov 124  }
   0x2   :  { %5 = vst [vmem:[#allocation0] sm:$0xf] %v4_v0  ;;  %s69_s13 = smov 123   ;;  %s70_s14 = smov 122  }
   0x3   :  { %s71_s15 = smov 121  }
   0x9   :  { %v9_v1 = vld [vmem:[#allocation0] sm:$0xf]  }
   0xa   :  { %v21_v2 = vld [vmem:[#allocation0] sm:$0xf]   ;;  %10 = vrot.lane.b32.xlu0 %v9_v1, %s65_s0 }
   0xb   :  { %22 = vrot.lane.b32.xlu1 %v21_v2, %s66_s8  ;;  %v15_v3 = vld [vmem:[#allocation0] sm:$0xf]  }
   0xc   :  { %v27_v4 = vld [vmem:[#allocation0] sm:$0xf]  }
   0xd   :  { %v6_v5 = vld [vmem:[#allocation0] sm:$0xf]  }
   0xe   :  { %8 = vst.msk [vmem:[%s118_s1] ss:$8 sm:$0xf] %vm7_vm0, %v6_v5   ;;  %16 = vrot.lane.b32.xlu0 %v15_v3, %s67_s11  ;;  %v33_v6 = vld [vmem:[#allocation0] sm:$0xf]  }
   0xf   :  { %28 = vrot.lane.b32.xlu1 %v27_v4, %s68_s12  ;;  %v39_v7 = vld [vmem:[#allocation0] sm:$0xf]  }
  0x10   :  { %v45_v8 = vld [vmem:[#allocation0] sm:$0xf]  }
  0x12   :  { %34 = vrot.lane.b32.xlu0 %v33_v6, %s69_s13 }
  0x13   :  { %40 = vrot.lane.b32.xlu1 %v39_v7, %s70_s14 }
  0x16   :  { %46 = vrot.lane.b32.xlu0 %v45_v8, %s71_s15 }
  0x7c   :  { %v11_v9 = vpop.permute.xlu0 %10  }
  0x7d   :  { %v23_v10 = vpop.permute.xlu1 %22   ;;  %51 = vst.msk [vmem:[%s118_s1 + $0x1] ss:$8 sm:$0xf] %vm7_vm0, %v11_v9  }
  0x7e   :  { %53 = vst.msk [vmem:[%s118_s1 + $0x3] ss:$8 sm:$0xf] %vm7_vm0, %v23_v10  }
  0x80   :  { %v17_v11 = vpop.permute.xlu0 %16  }
  0x81   :  { %v29_v12 = vpop.permute.xlu1 %28   ;;  %52 = vst.msk [vmem:[%s118_s1 + $0x2] ss:$8 sm:$0xf] %vm7_vm0, %v17_v11  }
  0x82   :  { %54 = vst.msk [vmem:[%s118_s1 + $0x4] ss:$8 sm:$0xf] %vm7_vm0, %v29_v12  }
  0x84   :  { %v35_v13 = vpop.permute.xlu0 %34  }
  0x85   :  { %v41_v14 = vpop.permute.xlu1 %40   ;;  %55 = vst.msk [vmem:[%s118_s1 + $0x5] ss:$8 sm:$0xf] %vm7_vm0, %v35_v13  }
  0x86   :  { %56 = vst.msk [vmem:[%s118_s1 + $0x6] ss:$8 sm:$0xf] %vm7_vm0, %v41_v14  }
  0x88   :  { %v47_v15 = vpop.permute.xlu0 %46  }
  0x89   :  { %57 = vst.msk [vmem:[%s118_s1 + $0x7] ss:$8 sm:$0xf] %vm7_vm0, %v47_v15  }

// kernel: deconv2d_block.1
= control target key start
LH: loop header
LB: loop body
LE: loop exit
PB: predicated region body
PF: predicated region fallthrough
CT: control target
= control target key end

     0   :  { %s878_s15 = smov 0   ;;  %s1048_s0 = inlined_call_operand.vmem [shape: bf16[2,4,256], index: 0, kind: input, shape index: {}]   ;;  %s1049_s1 = inlined_call_operand.vmem [shape: bf16[32,45], index: 1, kind: input, shape index: {}]   ;;  %s1050_s2 = inlined_call_operand.vmem [shape: f32[32,1], index: 2, kind: input, shape index: {}]   ;;  %s1051_s3 = inlined_call_operand.vmem [shape: bf16[2,256], index: 3, kind: input, shape index: {}]   ;;  %s1052_s4 = inlined_call_operand.vmem [shape: f32[2,32,256], index: 4, kind: output, shape index: {}]  }
   0x1 LB: > { %s769_s16 = sadd.s32 4294967295, %s834_s15   ;;  %p773_p0 = scmp.ge.s32.totalorder %s834_s15, 1  ;;  %s834_s15 = sphi %s878_s15, %s14_s15  }
   0x2   : > { %p162_p1 = scmp.lt.s32.totalorder %s834_s15, 3 }
   0x4   : > { %p163_p2 = pnand %p773_p0, %p162_p1 }
   0x5   : > { %p188_p3 = scmp.lt.s32.totalorder (!%p163_p2), %s769_s16, 1  ;;  %v246_v0 = vlaneseq (!%p163_p2)  ;;  %v779_v1 = vld.sshfl [vmem:[%s1051_s3] sm:$0x11 pattern:$0x75316420] (!%p163_p2)  ;;  %vm210_vm0 = vcmask (!%p163_p2), 1041408  }
   0x6   : > { %166 = sbr.rel (%p163_p2) target bundleno = 531 (0x213), region = 36  ;;  %v836_v2 = vmov (!%p163_p2), 1966171168   ;;  %v242_v6 = vcombine.high (!%p163_p2), %v779_v1, %v779_v1  ;;  %s837_s23 = smov (!%p163_p2), 17   ;;  %vm222_vm1 = vcmask (!%p163_p2), 138240   ;;  %vm307_vm2 = vcmask (!%p163_p2), 130048  }
   0x7   : > { %v244_v3 = vunpack.c.l.s4 (!%p163_p2), %v836_v2  ;;  %v247_v4 = vshrl.u32 (!%p163_p2), %v246_v0, 7  ;;  %s838_s24 = smov (!%p163_p2), 16   ;;  %s839_s25 = smov (!%p163_p2), 2   ;;  %vm331_vm3 = vcmask (!%p163_p2), 261120   ;;  %vm293_vm4 = vcmask (!%p163_p2), 15360  }
   0x8   : > { %s840_s26 = smov (!%p163_p2), 18   ;;  %s841_s27 = smov (!%p163_p2), 32   ;;  %vm343_vm5 = vcmask (!%p163_p2), 277504   ;;  %vm319_vm6 = vcmask (!%p163_p2), 146432   ;;  %vm379_vm7 = vcmask (!%p163_p2), 1039360   ;;  %vm540_vm8 = vcmask (!%p163_p2), 1042432  }
   0x9   : > { %v245_v5 = vunpack.c.0.s8 (!%p163_p2), %v244_v3  ;;  %v262_v9 = vsub.s32 (!%p163_p2), 0, %v247_v4  ;;  %s842_s28 = smov (!%p163_p2), 34   ;;  %s843_s29 = smov (!%p163_p2), 111   ;;  %vm541_vm9 = vsmask.f32 (!%p163_p2), 2304  ;;  %vm396_vm10 = vcmask (!%p163_p2), 1031168  }
   0xa   : > { %s844_s30 = smov (!%p163_p2), 127   ;;  %s845_s5 = smov (!%p163_p2), 95   ;;  %vm554_vm11 = vcmask (!%p163_p2), 1047552   ;;  %vm555_vm12 = vsmask.f32 (!%p163_p2), 7424  ;;  %vm542_vm13 = vmand (!%p163_p2), %vm540_vm8, %vm541_vm9  ;;  %vm432_vm14 = vcmask (!%p163_p2), 916480  }
   0xb   : > { %v248_v7 = vsub.s32 (!%p163_p2), %v245_v5, %v247_v4  ;;  %s846_s6 = smov (!%p163_p2), 96   ;;  %s847_s7 = smov (!%p163_p2), 126   ;;  %vm545_vm15 = vcmask (!%p163_p2), 1044480   ;;  %vm483_vm8 = vcmask (!%p163_p2), 900096   ;;  %vm537_vm9 = vcmask (!%p163_p2), 769024  }
   0xc   : > { %s848_s8 = smov (!%p163_p2), 112   ;;  %s849_s9 = smov (!%p163_p2), 94  }
   0xd   : > { %s1058_s16 = smov (!%p188_p3, %s769_s16), 1  ;;  %v249_v12 = vrot.slane %v779_v1, %v248_v7  ;;  %v256_v13 = vrot.slane %v242_v6, %v248_v7  ;;  %s850_s10 = smov 110  }
   0xe   : > { %s786_s19 = sshll.u32 %s1058_s16, 2 }
   0xf   : > { %s192_s22 = scalar_lea.vmem %s1048_s0, %s786_s19  ;;  %v258_v15 = vpack.i.b16 %v249_v12, %v249_v12  ;;  %v273_v16 = vshrl.u32 %v249_v12, 16  ;;  %v265_v17 = vpack.i.b16 %v256_v13, %v256_v13  ;;  %v280_v18 = vshrl.u32 %v256_v13, 16 }
  0x10   : > { %v778_v8 = vld.sshfl [vmem:[%s192_s22] sm:$0x33 pattern:$0x76325410] }
  0x11   : > { %v213_v10 = vsel %vm210_vm0, %v778_v8, 1065369472  ;;  %v209_v11 = vcombine.high %v778_v8, %v778_v8  ;;  %v897_v19 = vrot.slane %v258_v15, %v262_v9  ;;  %v274_v20 = vpack.i.b16 %v273_v16, %v273_v16 }
  0x12   : > { %218 = vrot.lane.b32.xlu0 %v213_v10, %s837_s23  ;;  %v900_v22 = vrot.slane %v265_v17, %v262_v9  ;;  %v281_v23 = vpack.i.b16 %v280_v18, %v280_v18 }
  0x13   : > { %v215_v14 = vsel %vm210_vm0, %v209_v11, 1065369472  ;;  %303 = vrot.lane.b32.xlu1 %v897_v19, %s838_s24  ;;  %v279_v21 = vrot.slane %v274_v20, %v262_v9 }
  0x14   : > { %v286_v24 = vrot.slane %v281_v23, %v262_v9 }
  0x16   : > { %220 = vrot.lane.b32.xlu0 %v215_v14, %s837_s23 }
  0x17   : > { %305 = vrot.lane.b32.xlu1 %v900_v22, %s838_s24 }
  0x1a   : > { %289 = vrot.lane.b32.xlu0 %v279_v21, %s839_s25 }
  0x1b   : > { %291 = vrot.lane.b32.xlu1 %v286_v24, %s839_s25  ;;  %s787_s25 = sshll.u32 %s1058_s16, 6 }
  0x1e   : > { %315 = vrot.lane.b32.xlu0 %v279_v21, %s840_s26 }
  0x1f   : > { %317 = vrot.lane.b32.xlu1 %v286_v24, %s840_s26 }
  0x22   : > { %327 = vrot.lane.b32.xlu0 %v897_v19, %s841_s27 }
  0x23   : > { %329 = vrot.lane.b32.xlu1 %v900_v22, %s841_s27 }
  0x26   : > { %339 = vrot.lane.b32.xlu0 %v279_v21, %s842_s28 }
  0x27   : > { %341 = vrot.lane.b32.xlu1 %v286_v24, %s842_s28  ;;  %s197_s28 = scalar_lea.vmem %s1052_s4, %s787_s25 }
  0x84   : > { %v219_v25 = vpop.permute.xlu0 %218 }
  0x85   : > { %v905_v26 = vsel %vm222_vm1, 0, %v219_v25  ;;  %v304_v33 = vpop.permute.xlu1 %303 }
  0x86   : > { %v441_v27 = vrot.slane %v905_v26, 6  ;;  %v351_v28 = vshrl.u32 %v905_v26, 16  ;;  %v354_v29 = vshll.u32 %v905_v26, 16  ;;  %v312_v9 = vmul.bf16 %v304_v33, %v905_v26 }
  0x88   : > { %444 = vrot.lane.b32.xlu1 %v441_v27, %s843_s29  ;;  %v221_v30 = vpop.permute.xlu0 %220  ;;  %v353_v36 = vrot.slane %v351_v28, 5  ;;  %v356_v37 = vrot.slane %v354_v29, 6  ;;  %v505_v44 = vrot.slane %v351_v28, 6  ;;  %v506_v46 = vrot.slane %v354_v29, 7 }
  0x89   : > { %v910_v31 = vsel %vm222_vm1, %v219_v25, %v221_v30  ;;  %v912_v32 = vsel %vm222_vm1, %v221_v30, 0  ;;  %v306_v41 = vpop.permute.xlu1 %305  ;;  %v400_v16 = vshll.u32 %v312_v9, 16  ;;  %vm556_vm1 = vmand %vm554_vm11, %vm555_vm12  ;;  %vm572_vm12 = vcmask 1046528  }
  0x8a   : > { %v443_v34 = vrot.slane %v912_v32, 6  ;;  %v442_v35 = vrot.slane %v910_v31, 6  ;;  %v366_v38 = vshrl.u32 %v912_v32, 16  ;;  %v369_v39 = vshll.u32 %v912_v32, 16 }
  0x8b   : > { %v357_v45 = vor.u32 %v356_v37, %v353_v36  ;;  %v359_v47 = vshrl.u32 %v910_v31, 16  ;;  %v362_v48 = vshll.u32 %v910_v31, 16  ;;  %v507_v52 = vor.u32 %v506_v46, %v505_v44 }
  0x8c   : > { %448 = vrot.lane.b32.xlu1 %v443_v34, %s843_s29  ;;  %446 = vrot.lane.b32.xlu0 %v442_v35, %s843_s29  ;;  %v290_v40 = vpop.permute.xlu0 %289  ;;  %v368_v42 = vrot.slane %v366_v38, 5  ;;  %v371_v43 = vrot.slane %v369_v39, 6  ;;  %v511_v60 = vrot.slane %v366_v38, 6  ;;  %v512_v61 = vrot.slane %v369_v39, 7 }
  0x8d   : > { %v292_v51 = vpop.permute.xlu1 %291  ;;  %v361_v53 = vrot.slane %v359_v47, 5  ;;  %v364_v54 = vrot.slane %v362_v48, 6  ;;  %v308_v62 = vsel %vm307_vm2, %v304_v33, %v306_v41  ;;  %v924_v2 = vmul.bf16 %v306_v41, %v912_v32 }
  0x8e   : > { %v372_v49 = vor.u32 %v371_v43, %v368_v42  ;;  %v513_v4 = vor.u32 %v512_v61, %v511_v60  ;;  %v313_v5 = vmul.bf16 %v308_v62, %v910_v31  ;;  %v508_v7 = vrot.slane %v359_v47, 6 }
  0x8f   : > { %v365_v58 = vor.u32 %v364_v54, %v361_v53  ;;  %v509_v8 = vrot.slane %v362_v48, 7  ;;  %v298_v10 = vmul.bf16 %v290_v40, %v905_v26  ;;  %v408_v13 = vshll.u32 %v924_v2, 16 }
  0x90   : > { %373 = vrot.lane.b32.xlu0 %v357_v45, %s844_s30  ;;  %v316_v50 = vpop.permute.xlu0 %315  ;;  %377 = vrot.lane.b32.xlu1 %v372_v49, %s844_s30  ;;  %v404_v12 = vshll.u32 %v313_v5, 16  ;;  %v300_v14 = vmul.bf16 %v292_v51, %v912_v32  ;;  %v294_v21 = vsel %vm293_vm4, %v290_v40, %v292_v51  ;;  %v402_v29 = vrot.slane %v400_v16, 1 }
  0x91   : > { %v318_v57 = vpop.permute.xlu1 %317  ;;  %v510_v15 = vor.u32 %v509_v8, %v508_v7  ;;  %v387_v17 = vrot.slane %v298_v10, 3  ;;  %v410_v20 = vrot.slane %v408_v13, 1  ;;  %v324_v25 = vmul.bf16 %v316_v50, %v905_v26 }
  0x92   : > { %v406_v18 = vrot.slane %v404_v12, 1  ;;  %v389_v23 = vrot.slane %v300_v14, 3  ;;  %v299_v27 = vmul.bf16 %v294_v21, %v910_v31  ;;  %v320_v34 = vsel %vm319_vm6, %v316_v50, %v318_v57 }
  0x93   : > { %v411_v35 = vshrl.u32 %v312_v9, 16  ;;  %v454_v36 = vshrl.u32 %v324_v25, 16  ;;  %v326_v38 = vmul.bf16 %v318_v57, %v912_v32  ;;  %v457_v40 = vshll.u32 %v324_v25, 16 }
  0x94   : > { %514 = vrot.lane.b32.xlu0 %v507_v52, %s845_s5  ;;  %v328_v55 = vpop.permute.xlu0 %327  ;;  %v819_v33 = vpack.i.bf16 %v410_v20, %v406_v18  ;;  %v388_v37 = vrot.slane %v299_v27, 3  ;;  %v325_v41 = vmul.bf16 %v320_v34, %v910_v31  ;;  %v414_v43 = vshrl.u32 %v313_v5, 16 }
  0x95   : > { %v336_v56 = vmul.bf16 %v328_v55, %v905_v26  ;;  %v330_v63 = vpop.permute.xlu1 %329  ;;  %v413_v42 = vor.u32 %v411_v35, %v402_v29  ;;  %v456_v44 = vrot.slane %v454_v36, 3  ;;  %v470_v45 = vshrl.u32 %v326_v38, 16 }
  0x96   : > { %v332_v0 = vsel %vm331_vm3, %v328_v55, %v330_v63  ;;  %v338_v1 = vmul.bf16 %v330_v63, %v912_v32  ;;  %v473_v46 = vshll.u32 %v326_v38, 16  ;;  %v459_v48 = vrot.slane %v457_v40, 4 }
  0x97   : > { %v491_v59 = vrot.slane %v336_v56, 1  ;;  %v337_v3 = vmul.bf16 %v332_v0, %v910_v31  ;;  %v462_v49 = vshrl.u32 %v325_v41, 16  ;;  %v465_v50 = vshll.u32 %v325_v41, 16 }
  0x98   : > { %375 = vrot.lane.b32.xlu0 %v365_v58, %s844_s30  ;;  %v493_v6 = vrot.slane %v338_v1, 1  ;;  %v340_v28 = vpop.permute.xlu0 %339  ;;  %v416_v51 = vor.u32 %v414_v43, %v406_v18  ;;  %v417_v52 = vshrl.u32 %v924_v2, 16  ;;  %v472_v53 = vrot.slane %v470_v45, 3  ;;  %v598_v2 = vld [vmem:[%s1050_s2 + $0x8] sm:$0xff] }
  0x99   : > { %494 = vrot.lane.b32.xlu1 %v491_v59, %s846_s6  ;;  %v492_v11 = vrot.slane %v337_v3, 1  ;;  %v342_v24 = vpop.permute.xlu1 %341  ;;  %v475_v54 = vrot.slane %v473_v46, 4  ;;  %v464_v56 = vrot.slane %v462_v49, 3  ;;  %v467_v57 = vrot.slane %v465_v50, 4  ;;  %v597_v3 = vld [vmem:[%s1050_s2] sm:$0xff] }
  0x9a   : > { %v344_v30 = vsel %vm343_vm5, %v340_v28, %v342_v24  ;;  %v419_v55 = vor.u32 %v417_v52, %v410_v20  ;;  %v460_v58 = vor.u32 %v459_v48, %v456_v44  ;;  %v348_v59 = vmul.bf16 %v340_v28, %v905_v26 }
  0x9b   : > { %v349_v39 = vmul.bf16 %v344_v30, %v910_v31  ;;  %v476_v60 = vor.u32 %v475_v54, %v472_v53  ;;  %v851_v61 = vmov 0   ;;  %v350_v62 = vmul.bf16 %v342_v24, %v912_v32  ;;  %v599_v32 = vld [vmem:[%s1050_s2 + $0x10] sm:$0xff] }
  0x9c   : > { %498 = vrot.lane.b32.xlu0 %v493_v6, %s846_s6  ;;  %677 = vmatprep.mubr.bf16.mxu0 %v851_v61  ;;  %v468_v63 = vor.u32 %v467_v57, %v464_v56  ;;  %v528_v0 = vrot.slane %v348_v59, 4  ;;  %v271_v28 = vmul.bf16 %v897_v19, %v905_v26  ;;  %vm568_vm2 = vsmask.f32 4352 }
  0x9d   : > { %518 = vrot.lane.b32.xlu1 %v513_v4, %s845_s5  ;;  %v529_v47 = vrot.slane %v349_v39, 4  ;;  %687 = vmatprep.mubr.bf16.mxu1 %v851_v61  ;;  %v530_v1 = vrot.slane %v350_v62, 4  ;;  %v600_v4 = vld [vmem:[%s1050_s2 + $0x18] sm:$0xff]  ;;  %vm638_vm3 = vcmask 1045504   ;;  %vm450_vm4 = vcmask 908288   ;;  %vm990_vm11 = vmand %vm545_vm15, %vm568_vm2 }
  0x9e   : > { %825 = vset.pattern.permute.xlu1 %v851_v61  ;;  %824 = vset.pattern.permute.xlu0 %v851_v61  ;;  %vm500_vm5 = vcmask 785408   ;;  %vm520_vm6 = vcmask 777216   ;;  %v852_v48 = vmov 65535  }
  0x9f   : > { %v639_v49 = vsel %vm638_vm3, 4294967295, %v852_v48 }
  0xa0   : > { %516 = vrot.lane.b32.xlu0 %v510_v15, %s845_s5 }
  0xa1   : > { %496 = vrot.lane.b32.xlu1 %v492_v11, %s846_s6 }
  0xa4   : > { %394 = vrot.lane.b32.xlu0 %v389_v23, %s847_s7 }
  0xa5   : > { %390 = vrot.lane.b32.xlu1 %v387_v17, %s847_s7 }
  0xa8   : > { %820 = vrot.lane.b32.xlu0 %v819_v33, %s848_s8 }
  0xa9   : > { %420 = vrot.lane.b32.xlu1 %v402_v29, %s848_s8  ;;  %v272_v29 = vmul.bf16 %v900_v22, %v910_v31 }
  0xac   : > { %426 = vrot.lane.b32.xlu0 %v413_v42, %s848_s8 }
  0xad   : > { %392 = vrot.lane.b32.xlu1 %v388_v37, %s847_s7 }
  0xb0   : > { %428 = vrot.lane.b32.xlu0 %v416_v51, %s848_s8 }
  0xb1   : > { %533 = vrot.lane.b32.xlu1 %v529_v47, %s849_s9 }
  0xb4   : > { %477 = vrot.lane.b32.xlu0 %v460_v58, %s850_s10 }
  0xb5   : > { %430 = vrot.lane.b32.xlu1 %v419_v55, %s848_s8 }
  0xb8   : > { %479 = vrot.lane.b32.xlu0 %v468_v63, %s850_s10 }
  0xb9   : > { %481 = vrot.lane.b32.xlu1 %v476_v60, %s850_s10 }
  0xbc   : > { %535 = vrot.lane.b32.xlu0 %v530_v1, %s849_s9 }
  0xbd   : > { %531 = vrot.lane.b32.xlu1 %v528_v0, %s849_s9 }
  0xc0   : > { %603 = vperm.xlu0 %824, %v597_v3  }
  0xc1   : > { %608 = vperm.xlu1 %825, %v598_v2  }
  0xc4   : > { %618 = vperm.xlu0 %824, %v600_v4  }
  0xc5   : > { %613 = vperm.xlu1 %825, %v599_v32  }
  0xfa   : > { %v959_v5 = vpop.permute.xlu1 %444 }
  0xfe   : > { %v961_v6 = vpop.permute.xlu0 %446  ;;  %v963_v8 = vpop.permute.xlu1 %448 }
  0xff   : > { %v451_v50 = vsel %vm450_vm4, %v959_v5, %v961_v6  ;;  %v452_v51 = vsel %vm450_vm4, %v961_v6, %v963_v8  ;;  %v640_v5 = vsel %vm572_vm12, %v639_v49, 0 }
 0x102   : > { %v374_v7 = vpop.permute.xlu0 %373  ;;  %v378_v10 = vpop.permute.xlu1 %377 }
 0x106   : > { %v965_v9 = vpop.permute.xlu0 %514 }
 0x10a   : > { %v376_v12 = vpop.permute.xlu0 %375 }
 0x10b   : > { %v967_v11 = vpop.permute.xlu1 %494  ;;  %v380_v23 = vsel %vm379_vm7, %v374_v7, %v376_v12  ;;  %v381_v24 = vsel %vm379_vm7, %v376_v12, %v378_v10  ;;  %vm582_vm7 = vsmask.f32 1280  ;;  %v826_v12 = vld [vmem:[%s1049_s1] sm:$0xff]  }
 0x10c   : > { %v543_v33 = vsel %vm542_vm13, %v271_v28, %v380_v23  ;;  %v544_v34 = vsel %vm542_vm13, %v272_v29, %v381_v24  ;;  %vm1006_vm13 = vmand %vm210_vm0, %vm582_vm7 }
 0x10e   : > { %v971_v14 = vpop.permute.xlu0 %498 }
 0x10f   : > { %v969_v13 = vpop.permute.xlu1 %518 }
 0x112   : > { %v975_v16 = vpop.permute.xlu0 %516 }
 0x113   : > { %v973_v15 = vpop.permute.xlu1 %496  ;;  %v521_v53 = vsel %vm520_vm6, %v965_v9, %v975_v16  ;;  %v522_v61 = vsel %vm520_vm6, %v975_v16, %v969_v13  ;;  %v827_v13 = vld [vmem:[%s1049_s1 + $0x8] sm:$0xff]  }
 0x114   : > { %v501_v52 = vsel %vm500_vm5, %v967_v11, %v973_v15  ;;  %v502_v60 = vsel %vm500_vm5, %v973_v15, %v971_v14 }
 0x115   : > { %v584_v3 = vsel %vm1006_vm13, %v501_v52, %v521_v53  ;;  %v585_v6 = vsel %vm1006_vm13, %v502_v60, %v522_v61 }
 0x116   : > { %v395_v18 = vpop.permute.xlu0 %394 }
 0x117   : > { %v391_v17 = vpop.permute.xlu1 %390 }
 0x11a   : > { %v821_v21 = vpop.permute.xlu0 %820 }
 0x11b   : > { %v421_v20 = vpop.permute.xlu1 %420  ;;  %v823_v25 = vunpack.i.h.bf16 %v821_v21  ;;  %v822_v27 = vunpack.i.l.bf16 %v821_v21 }
 0x11d   : > { %v434_v38 = vsel %vm432_vm14, %v822_v27, %v823_v25  ;;  %v433_v19 = vsel %vm432_vm14, %v421_v20, %v822_v27 }
 0x11e   : > { %v427_v37 = vpop.permute.xlu0 %426 }
 0x11f   : > { %v393_v30 = vpop.permute.xlu1 %392 }
 0x120   : > { %v397_v35 = vsel %vm396_vm10, %v391_v17, %v393_v30  ;;  %v398_v36 = vsel %vm396_vm10, %v393_v30, %v395_v18  ;;  %vm586_vm10 = vcmask 1043456  }
 0x121   : > { %v552_v39 = vsel %vm545_vm15, %v544_v34, %v398_v36  ;;  %v548_v26 = vsel %vm545_vm15, %v543_v33, %v397_v35 }
 0x122   : > { %v558_v22 = vsel %vm556_vm1, %v552_v39, %v434_v38  ;;  %v557_v31 = vsel %vm556_vm1, %v548_v26, %v433_v19  ;;  %v429_v41 = vpop.permute.xlu0 %428 }
 0x123   : > { %v534_v40 = vpop.permute.xlu1 %533  ;;  %645 = vmatprep.subr.bf16.mxu0 %v558_v22  ;;  %788 = vmatprep.subr.bf16.mxu1 %v558_v22  ;;  %v435_v44 = vsel %vm432_vm14, %v427_v37, %v429_v41 }
 0x124   : > { %646 = vmatpush1.bf16.msra.mxu0 %v557_v31  ;;  %791 = vmatpush1.bf16.msra.mxu1 %v557_v31  ;;  %v561_v56 = vsel %vm210_vm0, %v435_v44, %v451_v50 }
 0x126   : > { %v478_v43 = vpop.permute.xlu0 %477 }
 0x127   : > { %v431_v42 = vpop.permute.xlu1 %430 }
 0x128   : > { %v436_v45 = vsel %vm432_vm14, %v429_v41, %v431_v42 }
 0x129   : > { %v565_v57 = vsel %vm210_vm0, %v436_v45, %v452_v51  ;;  %vm631_vm0 = vcmask 367616  }
 0x12a   : > { %v480_v54 = vpop.permute.xlu0 %479 }
 0x12b   : > { %v482_v46 = vpop.permute.xlu1 %481  ;;  %v484_v58 = vsel %vm483_vm8, %v478_v43, %v480_v54 }
 0x12c   : > { %v485_v59 = vsel %vm483_vm8, %v480_v54, %v482_v46  ;;  %v570_v63 = vsel %vm990_vm11, %v561_v56, %v484_v58 }
 0x12d   : > { %v571_v62 = vsel %vm990_vm11, %v565_v57, %v485_v59  ;;  %v575_v2 = vsel %vm572_vm12, %v570_v63, %v501_v52 }
 0x12e   : > { %v579_v1 = vsel %vm572_vm12, %v571_v62, %v502_v60  ;;  %v536_v4 = vpop.permute.xlu0 %535 }
 0x12f   : > { %v532_v0 = vpop.permute.xlu1 %531  ;;  %647 = vmatprep.subr.bf16.mxu0 %v579_v1  ;;  %789 = vmatprep.subr.bf16.mxu1 %v579_v1  ;;  %v539_v8 = vsel %vm537_vm9, %v534_v40, %v536_v4 }
 0x130   : > { %v538_v32 = vsel %vm537_vm9, %v532_v0, %v534_v40  ;;  %648 = vmatpush1.bf16.msra.mxu0 %v575_v2  ;;  %792 = vmatpush1.bf16.msra.mxu1 %v575_v2  ;;  %v592_v9 = vsel %vm586_vm10, %v585_v6, %v539_v8 }
 0x131   : > { %v589_v7 = vsel %vm586_vm10, %v584_v3, %v538_v32  ;;  %v643_v10 = vand.u32 %v640_v5, %v592_v9 }
 0x132   : > { %v641_v11 = vand.u32 %v640_v5, %v589_v7 }
 0x133   : > { %649 = vmatprep.subr.bf16.mxu0 %v643_v10  ;;  %790 = vmatprep.subr.bf16.mxu1 %v643_v10 }
 0x134   : > { %650 = vmatpush1.bf16.msra.mxu0 %v641_v11  ;;  %793 = vmatpush1.bf16.msra.mxu1 %v641_v11 }
 0x137   : > { %782 = vmatmul.mubr.msk.bf16.vlgmr.msra.gmra.mrb[0].mxu0 %vm631_vm0, %v826_v12  ;;  %783 = vmatmul.mubr.msk.bf16.vlgmr.msra.gmra.mrb[0].mxu1 %vm631_vm0, %v827_v13 }
 0x13f   : > { %v604_v15 = vpop.permute.xlu0 %603 }
 0x140   : > { %v609_v14 = vpop.permute.xlu1 %608 }
 0x143   : > { %v619_v17 = vpop.permute.xlu0 %618 }
 0x144   : > { %v614_v16 = vpop.permute.xlu1 %613 }
 0x20a   : > { %v679_v18 = vpop.f32.mrb[0].mxu0  ;;  %v689_v20 = vpop.f32.mrb[0].mxu1 }
 0x20b   : > { %v680_v21 = vadd.f32 %v679_v18, %v604_v15  ;;  %v690_v23 = vadd.f32 %v689_v20, %v614_v16  ;;  %v681_v24 = vpop.f32.mrb[1].mxu0  ;;  %v691_v25 = vpop.f32.mrb[1].mxu1 }
 0x20c   : > { %v682_v27 = vadd.f32 %v681_v24, %v604_v15  ;;  %v692_v28 = vadd.f32 %v691_v25, %v614_v16  ;;  %v683_v29 = vpop.f32.mrb[2].mxu0  ;;  %v693_v30 = vpop.f32.mrb[2].mxu1 }
 0x20d   : > { %v698_v33 = vmax.f32 %v680_v21, 0.0  ;;  %v702_v34 = vmax.f32 %v690_v23, 0.0  ;;  %v684_v35 = vadd.f32 %v683_v29, %v609_v14  ;;  %v694_v36 = vadd.f32 %v693_v30, %v619_v17  ;;  %v685_v37 = vpop.f32.mrb[3].mxu0  ;;  %v695_v38 = vpop.f32.mrb[3].mxu1 }
 0x20e   : > { %v699_v39 = vmax.f32 %v682_v27, 0.0  ;;  %v703_v19 = vmax.f32 %v692_v28, 0.0  ;;  %v686_v26 = vadd.f32 %v685_v37, %v609_v14  ;;  %v696_v22 = vadd.f32 %v695_v38, %v619_v17 }
 0x20f   : > { %706 = vst [vmem:[%s197_s28] sm:$0xff] %v698_v33  ;;  %710 = vst [vmem:[%s197_s28 + $0x20] sm:$0xff] %v702_v34  ;;  %v700_v31 = vmax.f32 %v684_v35, 0.0  ;;  %v704_v40 = vmax.f32 %v694_v36, 0.0 }
 0x210   : > { %707 = vst [vmem:[%s197_s28 + $0x8] sm:$0xff] %v699_v39  ;;  %711 = vst [vmem:[%s197_s28 + $0x28] sm:$0xff] %v703_v19  ;;  %v701_v41 = vmax.f32 %v686_v26, 0.0  ;;  %v705_v42 = vmax.f32 %v696_v22, 0.0 }
 0x211   : > { %708 = vst [vmem:[%s197_s28 + $0x10] sm:$0xff] %v700_v31  ;;  %712 = vst [vmem:[%s197_s28 + $0x30] sm:$0xff] %v704_v40 }
 0x212   : > { %709 = vst [vmem:[%s197_s28 + $0x18] sm:$0xff] %v701_v41  ;;  %713 = vst [vmem:[%s197_s28 + $0x38] sm:$0xff] %v705_v42 }
 0x213 PF: > { %s14_s15 = sadd.s32 1, %s834_s15  }
 0x214   : > { %p11_p4 = scmp.ge.s32.totalorder %s14_s15, 4  }
 0x216   :  { %13 = sbr.rel (!%p11_p4) target bundleno = 1 (0x1), region = 66 }

</bundles_post_ra>
